<compile_context>
chip_gen: v6e
topology: v6e:2x2x1
jax: 0.10.0
libtpu: 0.0.40
codegen_flags: <defaults>
</compile_context>

<pallas_src>
import jax
import jax.numpy as jnp
from jax.experimental import pallas as pl
from jax.experimental.pallas import tpu as pltpu

LANE = 128
SUBLANE = 8


def _round_up(x, m):
    return (x + m - 1) // m * m


# --------------------------------------------------------------------------
# Kernel 1: batch-independent (transposed) category-pair table
#   Tt = bT @ aw   with  bT[c1, k*M+m] = B_k[m, c1],  aw[k*M+m, c0] = w_k * A_k[m, c0]
# Reduction grid over the packed (k, m) axis, accumulating into the resident
# output block.
# --------------------------------------------------------------------------
def _table_kernel(bT_ref, aw_ref, t_ref):
    @pl.when(pl.program_id(0) == 0)
    def _init():
        t_ref[...] = jnp.zeros_like(t_ref)

    t_ref[...] += jnp.dot(bT_ref[...], aw_ref[...],
                          preferred_element_type=jnp.float32)


def build_pair_table(packed):
    """Returns Tt with Tt[c1, c0] = sum_{k,m} w_k * A_k[m, c0] * B_k[m, c1]."""
    bT, aw, tk = packed["bT"], packed["aw"], packed["tk"]
    mp, kp = bT.shape
    return pl.pallas_call(
        _table_kernel,
        out_shape=jax.ShapeDtypeStruct((mp, mp), jnp.float32),
        grid_spec=pltpu.PrefetchScalarGridSpec(
            num_scalar_prefetch=0,
            grid=(kp // tk,),
            in_specs=[pl.BlockSpec((mp, tk), lambda k: (0, k)),
                      pl.BlockSpec((tk, mp), lambda k: (k, 0))],
            out_specs=pl.BlockSpec((mp, mp), lambda k: (0, 0)),
        ),
        compiler_params=pltpu.CompilerParams(
            dimension_semantics=("arbitrary",),
            vmem_limit_bytes=48 * 1024 * 1024,  # fits v7x's 64 MiB with headroom
        ),
    )(bT, aw)


# --------------------------------------------------------------------------
# Kernel 2: batched log-probability lookup, batch on the lane axis.
#   out[b] = log( T[x0[b], x1[b]] )
# One-hot encodings are built in-kernel with a sublane iota (no data-dependent
# gather); one MXU matmul with N = tb against the VMEM-resident table, then a
# cross-sublane reduce (XLU) selects the x1 row.  Output is compact (1, tb).
# --------------------------------------------------------------------------
def _logprob_kernel(x_ref, t_ref, o_ref):
    mp = t_ref.shape[0]
    tb = x_ref.shape[1]

    xv = x_ref[...]                                              # (2, tb) int32
    cats = jax.lax.broadcasted_iota(jnp.int32, (mp, tb), 0)      # sublane iota
    oh0 = (cats == xv[0:1, :]).astype(jnp.float32)               # one_hot(x0): (Mp, tb)
    oh1 = (cats == xv[1:2, :]).astype(jnp.float32)               # one_hot(x1): (Mp, tb)

    # v[c1, b] = sum_{c0} Tt[c1, c0] * oh0[c0, b] = T[x0[b], c1]
    v = jnp.dot(t_ref[...], oh0, preferred_element_type=jnp.float32)   # (Mp, tb)
    s = jnp.sum(v * oh1, axis=0, keepdims=True)                  # (1, tb) = T[x0, x1]
    o_ref[...] = jnp.log(s)


def hclt_forward(x, packed, table=None, *, tb=2048):
    """x: (B, 2) int32 categories in [0, num_categories).  Returns (B,) float32
    log-probabilities.

    `table` (the batch-independent pair table from build_pair_table) should be
    precomputed once per parameter set and passed in; building it dominates HBM
    traffic otherwise.
    """
    if table is None:
        table = build_pair_table(packed)
    mp = table.shape[0]

    batch, num_vars = x.shape
    assert num_vars == 2, "only the 2-variable chain HCLT has a defined forward"

    # Batch tiling: batch lives on the lane axis, so tiles are multiples of 128.
    # Keep >= 2 grid steps when the batch allows so v7x's two TensorCores both
    # get work ("parallel" axis); v5e/v6e (1 TC) are unaffected.
    b_pad0 = _round_up(batch, LANE)
    tb = _round_up(max(LANE, min(tb, b_pad0)), LANE)
    if b_pad0 >= 2 * LANE:
        tb = min(tb, max(LANE, (b_pad0 // 2) // LANE * LANE))
    b_pad = _round_up(b_pad0, tb)

    # Transpose / pad x to a lane-dense (2, b_pad) slab.  Padding uses category 0
    # (valid), padded lanes are sliced off below.  NOTE: categories must be in
    # [0, num_categories); values in the 128-padding range would select zeroed
    # table entries and yield -inf (the reference would raise instead).
    xT = jnp.zeros((2, b_pad), jnp.int32).at[:, :batch].set(x.T.astype(jnp.int32))

    cost = pl.CostEstimate(
        flops=int(2 * b_pad * mp * mp + 3 * b_pad * mp),
        transcendentals=int(b_pad),
        bytes_accessed=int(2 * b_pad * 4 + mp * mp * 4 + b_pad * 4),
    )

    out = pl.pallas_call(
        _logprob_kernel,
        out_shape=jax.ShapeDtypeStruct((1, b_pad), jnp.float32),
        grid_spec=pltpu.PrefetchScalarGridSpec(
            num_scalar_prefetch=0,
            grid=(b_pad // tb,),
            in_specs=[pl.BlockSpec((2, tb), lambda i: (0, i)),     # batch tile of x (lane-dense)
                      pl.BlockSpec((mp, mp), lambda i: (0, 0))],   # table, VMEM-resident
            out_specs=pl.BlockSpec((1, tb), lambda i: (0, i)),     # compact lane-dense output
        ),
        compiler_params=pltpu.CompilerParams(
            dimension_semantics=("parallel",),          # megacore-shardable batch axis
            vmem_limit_bytes=32 * 1024 * 1024,
        ),
        cost_estimate=cost,
    )(xT, table)
    return out[0, :batch]


# --------------------------------------------------------------------------
# Parameter construction (mimics HCLT.__init__ for num_vars == 2) and packing.
# --------------------------------------------------------------------------
def init_params(key, num_categories):
    """A[k] = params[f'input_{k}'] (var 0), B[k] = params[f'input_{M+k}'] (var 1),
    w = params[f'sum_{3M}'].  All softmax-initialized like the PyTorch module."""
    m = num_categories
    ka, kb, kw = jax.random.split(key, 3)
    a = jax.nn.softmax(jax.random.normal(ka, (m, m, m), dtype=jnp.float32), axis=-1)
    b = jax.nn.softmax(jax.random.normal(kb, (m, m, m), dtype=jnp.float32), axis=-1)
    w = jax.nn.softmax(jax.random.normal(kw, (m,), dtype=jnp.float32))
    return a, b, w


def pack_params(a, b, w, *, max_tk=4096):
    """Pack all PC parameters into two zero-padded, lane-dense (128-wide) slabs:
       bT[c1, k*M+m] = B[k, m, c1]
       aw[k*M+m, c0] = w_k * A[k, m, c0]   (sum-node weights folded in)
    so the whole parameter set moves HBM->VMEM in 2 DMAs and kernel 1 directly
    produces the transposed table Tt = bT @ aw used by kernel 2."""
    m = a.shape[0]
    k = m * m
    mp = _round_up(m, LANE)
    if k >= LANE:
        tk = min(_round_up(k, LANE), max_tk)
        kp = _round_up(k, tk)
    else:
        tk = kp = _round_up(k, SUBLANE)

    aw = (w[:, None, None] * a).reshape(k, m)                     # (K, M) = w_k*A[k,m,c0]
    b2 = b.reshape(k, m)                                          # (K, M) = B[k,m,c1]
    bT_p = jnp.zeros((mp, kp), jnp.float32).at[:m, :k].set(b2.T)
    aw_p = jnp.zeros((kp, mp), jnp.float32).at[:k, :m].set(aw)
    return {"bT": bT_p, "aw": aw_p, "tk": tk, "m": m, "mp": mp}


# --------------------------------------------------------------------------
# Plain-JAX reference: literal transcription of HCLT.forward (2-variable case).
# --------------------------------------------------------------------------
def reference_forward(x, a, b, w):
    la = jnp.log(a[:, :, x[:, 0]])          # input nodes, var 0: (K, M, B)
    lb = jnp.log(b[:, :, x[:, 1]])          # input nodes, var 1: (K, M, B)
    prod = la + lb                          # product nodes
    root = jnp.log(jnp.sum(w[:, None, None] * jnp.exp(prod), axis=0))  # sum node: (M, B)
    return jax.scipy.special.logsumexp(root, axis=0)                   # (B,)


if __name__ == "__main__":
    num_vars = 2          # the reference PC only has a root for the 2-variable chain
    num_categories = 16
    batch = 8

    key = jax.random.PRNGKey(0)
    key, kx, kx2 = jax.random.split(key, 3)
    a, b, w = init_params(key, num_categories)
    packed = pack_params(a, b, w)

    # Build the batch-independent pair table once and reuse it.
    table = jax.block_until_ready(build_pair_table(packed))

    # Small case.
    x = jax.random.randint(kx, (batch, num_vars), 0, num_categories, dtype=jnp.int32)
    out = jax.block_until_ready(hclt_forward(x, packed, table))
    ref = reference_forward(x, a, b, w)
    assert out.shape == (batch,)
    # Loose atol: MXU f32 matmuls may run via reduced-precision passes on some gens.
    assert jnp.allclose(out, ref, atol=5e-2, rtol=1e-3), (out, ref)

    # Second case exercising multi-tile grid + batch padding path.
    batch2 = 300
    x2 = jax.random.randint(kx2, (batch2, num_vars), 0, num_categories, dtype=jnp.int32)
    out2 = jax.block_until_ready(hclt_forward(x2, packed, table))
    ref2 = reference_forward(x2, a, b, w)
    assert out2.shape == (batch2,)
    assert jnp.allclose(out2, ref2, atol=5e-2, rtol=1e-3), (out2, ref2)

    print("KERNEL_OK")
</pallas_src>

<mosaic_0001>
module attributes {stable_mosaic.version = 11 : i64} {
  func.func @_table_kernel(%arg0: i32, %arg1: memref<128x256xf32, #tpu.memory_space<vmem>>, %arg2: memref<256x128xf32, #tpu.memory_space<vmem>>, %arg3: memref<128x128xf32, #tpu.memory_space<vmem>>) attributes {dimension_semantics = [#tpu.dimension_semantics<arbitrary>], iteration_bounds = array<i64: 1>, scalar_prefetch = 0 : i64, scratch_operands = 0 : i64, tpu.core_type = #tpu.core_type<tc>, window_params = [{transform_indices = @transform_0, window_bounds = array<i64: 128, 256>}, {transform_indices = @transform_1, window_bounds = array<i64: 256, 128>}, {pipeline_mode = #tpu.pipeline_mode<synchronous>, transform_indices = @transform_2, window_bounds = array<i64: 128, 128>}]} {
    %c0_i32 = arith.constant 0 : i32
    %0 = arith.cmpi eq, %arg0, %c0_i32 : i32
    %1 = arith.extui %0 : i1 to i32
    %c0_i32_0 = arith.constant 0 : i32
    %2 = arith.cmpi ne, %1, %c0_i32_0 : i32
    scf.if %2 {
      %cst_8 = arith.constant 0.000000e+00 : f32
      %9 = vector.broadcast %cst_8 : f32 to vector<128x128xf32>
      %c0_9 = arith.constant 0 : index
      %c0_10 = arith.constant 0 : index
      %10 = vector.load %arg3[%c0_9, %c0_10] : memref<128x128xf32, #tpu.memory_space<vmem>>, vector<128x128xf32>
      tpu.vector_store %arg3[%c0_9, %c0_10], %9 {strides = array<i32>} : memref<128x128xf32, #tpu.memory_space<vmem>>, vector<128x128xf32>,
    } else {
    }
    %c0 = arith.constant 0 : index
    %c0_1 = arith.constant 0 : index
    %3 = vector.load %arg3[%c0, %c0_1] : memref<128x128xf32, #tpu.memory_space<vmem>>, vector<128x128xf32>
    %c0_2 = arith.constant 0 : index
    %c0_3 = arith.constant 0 : index
    %4 = vector.load %arg1[%c0_2, %c0_3] : memref<128x256xf32, #tpu.memory_space<vmem>>, vector<128x256xf32>
    %c0_4 = arith.constant 0 : index
    %c0_5 = arith.constant 0 : index
    %5 = vector.load %arg2[%c0_4, %c0_5] : memref<256x128xf32, #tpu.memory_space<vmem>>, vector<256x128xf32>
    %cst = arith.constant dense<0.000000e+00> : vector<128x128xf32>
    %6 = tpu.matmul %4, %5, %cst {dimension_numbers = #tpu.dot_dimension_numbers<[1], [0], [0], [1], [0, 0, 1, 1], [], []>} : vector<128x256xf32>, vector<256x128xf32>, vector<128x128xf32> -> vector<128x128xf32>
    %7 = arith.addf %3, %6 : vector<128x128xf32>
    %c0_6 = arith.constant 0 : index
    %c0_7 = arith.constant 0 : index
    %8 = vector.load %arg3[%c0_6, %c0_7] : memref<128x128xf32, #tpu.memory_space<vmem>>, vector<128x128xf32>
    tpu.vector_store %arg3[%c0_6, %c0_7], %7 {strides = array<i32>} : memref<128x128xf32, #tpu.memory_space<vmem>>, vector<128x128xf32>,
    return
  }
  func.func @transform_0(%arg0: i32) -> (i32, i32) {
    %c0_i32 = arith.constant 0 : i32
    %c0_i32_0 = arith.constant 0 : i32
    return %c0_i32, %arg0 : i32, i32
  }
  func.func @transform_1(%arg0: i32) -> (i32, i32) {
    %c0_i32 = arith.constant 0 : i32
    %c0_i32_0 = arith.constant 0 : i32
    return %arg0, %c0_i32 : i32, i32
  }
  func.func @transform_2(%arg0: i32) -> (i32, i32) {
    %c0_i32 = arith.constant 0 : i32
    %c0_i32_0 = arith.constant 0 : i32
    %c0_i32_1 = arith.constant 0 : i32
    return %c0_i32, %c0_i32_0 : i32, i32
  }
}

</mosaic_0001>

<bundles_post_ra>
// kernel: tpu_custom_call.1
= control target key start
LH: loop header
LB: loop body
LE: loop exit
PB: predicated region body
PF: predicated region fallthrough
CT: control target
= control target key end

     0   :  { %7 = vsyncpa [#allocation3], 0  ;;  %s558_s0 = inlined_call_operand.hbm [shape: f32[128,256], index: 0, kind: input, shape index: {}]   ;;  %s559_s1 = inlined_call_operand.hbm [shape: f32[256,128], index: 1, kind: input, shape index: {}]   ;;  %s560_s2 = inlined_call_operand.hbm [shape: f32[128,128], index: 2, kind: output, shape index: {}]  }
   0x1   :  { %8 = vsyncpa [#allocation6], 0 }
   0x2   :  { %9 = vsyncpa [#allocation4], 0  ;;  %s521_s9 = smov [#allocation2]  }
   0x3   :  { %s15_s10 = sshll.u32 %s521_s9, 4  ;;  %s16_s10 = int_to_ptr.vmem [resolvable:$true] %s15_s10 }
   0x4   :  { %s463_s11 = scalar_lea.vmem %s16_s10, 4096  ;;  %p468_p1 = scmp.lt.s32.totalorder %s16_s10, %s16_s10 }
   0x5   :  { %p464_p0 = scmp.ne.s32.totalorder %s16_s10, %s463_s11  ;;  %p469_p2 = scmp.lt.s32.totalorder %s463_s11, %s463_s11 }
   0x7   :  { %p470_p3 = por %p469_p2, %p468_p1 }
   0x9   :  { %p471_p4 = pnand %p470_p3, %p464_p0 }
   0xb   :  { %474 = shalt.err (!%p471_p4)
}
   0xc   :  { %s522_s12 = smov 256   ;;  %s523_s13 = smov 16  }
   0xd   :  { %21 = dma.hbm_to_vmem [thread:$0]  %s558_s0, 4096, %s16_s10, [#allocation3], %s522_s12, %s522_s12, %s523_s13  }
   0xe   :  { %s524_s16 = smov [#allocation5]  }
   0xf   :  { %s27_s17 = sshll.u32 %s524_s16, 4  ;;  %s28_s17 = int_to_ptr.vmem [resolvable:$true] %s27_s17 }
  0x10   :  { %s483_s18 = scalar_lea.vmem %s28_s17, 4096  ;;  %p488_p6 = scmp.lt.s32.totalorder %s28_s17, %s28_s17 }
  0x11   :  { %p484_p5 = scmp.ne.s32.totalorder %s28_s17, %s483_s18  ;;  %p489_p7 = scmp.lt.s32.totalorder %s483_s18, %s483_s18 }
  0x13   :  { %p490_p8 = por %p489_p7, %p488_p6 }
  0x15   :  { %p491_p9 = pnand %p490_p8, %p484_p5 }
  0x17   :  { %494 = shalt.err (!%p491_p9)
}
  0x18   :  { %s525_s19 = smov 128   ;;  %s526_s20 = smov 8  }
  0x19   :  { %33 = dma.hbm_to_vmem [thread:$0]  %s559_s1, 4096, %s28_s17, [#allocation6], %s525_s19, %s525_s19, %s526_s20  }
  0x1a   :  { %515 = dma.done.wait [#allocation3], 4096  }
  0x1b   :  { %516 = vsyncadd [#allocation3], 4294963200 }
  0x1c   :  { %517 = dma.done.wait [#allocation6], 4096  }
  0x1d   :  { %518 = vsyncadd [#allocation6], 4294963200  ;;  %v139_v0 = vld [vmem:[#allocation5 + $0xf8] sm:$0xff]  ;;  %v138_v2 = vld [vmem:[#allocation5 + $0xf0] sm:$0xff]  ;;  %s527_s0 = smov [#allocation7]  }
  0x1e   :  { %v123_v1 = vld [vmem:[#allocation5 + $0x78] sm:$0xff]  ;;  %335 = vmatprep.subr.mxu0 %v139_v0  ;;  %415 = vmatprep.subr.mxu1 %v139_v0  ;;  %v122_v3 = vld [vmem:[#allocation5 + $0x70] sm:$0xff]  ;;  %v137_v4 = vld [vmem:[#allocation5 + $0xe8] sm:$0xff]  ;;  %s322_s1 = sshll.u32 %s527_s0, 4  ;;  %s323_s1 = int_to_ptr.vmem [resolvable:$true] %s322_s1 }
  0x1f   :  { %336 = vmatpush3.msra.mxu0 %v123_v1  ;;  %431 = vmatpush3.msra.mxu1 %v123_v1  ;;  %v121_v5 = vld [vmem:[#allocation5 + $0x68] sm:$0xff]  ;;  %v136_v6 = vld [vmem:[#allocation5 + $0xe0] sm:$0xff]  ;;  %v135_v8 = vld [vmem:[#allocation5 + $0xd8] sm:$0xff]  ;;  %s495_s23 = scalar_lea.vmem %s323_s1, 2048  ;;  %p500_p11 = scmp.lt.s32.totalorder %s323_s1, %s323_s1 }
  0x20   :  { %337 = vmatprep.subr.mxu0 %v138_v2  ;;  %416 = vmatprep.subr.mxu1 %v138_v2  ;;  %v120_v7 = vld [vmem:[#allocation5 + $0x60] sm:$0xff]  ;;  %v119_v9 = vld [vmem:[#allocation5 + $0x58] sm:$0xff]  ;;  %v134_v10 = vld [vmem:[#allocation5 + $0xd0] sm:$0xff]  ;;  %p496_p10 = scmp.ne.s32.totalorder %s323_s1, %s495_s23  ;;  %p501_p12 = scmp.lt.s32.totalorder %s495_s23, %s495_s23 }
  0x21   :  { %338 = vmatpush3.msra.mxu0 %v122_v3  ;;  %432 = vmatpush3.msra.mxu1 %v122_v3  ;;  %v118_v11 = vld [vmem:[#allocation5 + $0x50] sm:$0xff]  ;;  %v133_v12 = vld [vmem:[#allocation5 + $0xc8] sm:$0xff]  ;;  %v132_v14 = vld [vmem:[#allocation5 + $0xc0] sm:$0xff] }
  0x22   :  { %339 = vmatprep.subr.mxu0 %v137_v4  ;;  %417 = vmatprep.subr.mxu1 %v137_v4  ;;  %v117_v13 = vld [vmem:[#allocation5 + $0x48] sm:$0xff]  ;;  %v116_v15 = vld [vmem:[#allocation5 + $0x40] sm:$0xff]  ;;  %v131_v16 = vld [vmem:[#allocation5 + $0xb8] sm:$0xff]  ;;  %p502_p13 = por %p501_p12, %p500_p11 }
  0x23   :  { %340 = vmatpush3.msra.mxu0 %v121_v5  ;;  %433 = vmatpush3.msra.mxu1 %v121_v5  ;;  %v115_v17 = vld [vmem:[#allocation5 + $0x38] sm:$0xff]  ;;  %v130_v18 = vld [vmem:[#allocation5 + $0xb0] sm:$0xff]  ;;  %v129_v20 = vld [vmem:[#allocation5 + $0xa8] sm:$0xff] }
  0x24   :  { %341 = vmatprep.subr.mxu0 %v136_v6  ;;  %418 = vmatprep.subr.mxu1 %v136_v6  ;;  %v114_v19 = vld [vmem:[#allocation5 + $0x30] sm:$0xff]  ;;  %v113_v21 = vld [vmem:[#allocation5 + $0x28] sm:$0xff]  ;;  %v128_v22 = vld [vmem:[#allocation5 + $0xa0] sm:$0xff]  ;;  %p503_p0 = pnand %p502_p13, %p496_p10 }
  0x25   :  { %342 = vmatpush3.msra.mxu0 %v120_v7  ;;  %434 = vmatpush3.msra.mxu1 %v120_v7  ;;  %v112_v23 = vld [vmem:[#allocation5 + $0x20] sm:$0xff]  ;;  %v127_v24 = vld [vmem:[#allocation5 + $0x98] sm:$0xff]  ;;  %v126_v26 = vld [vmem:[#allocation5 + $0x90] sm:$0xff] }
  0x26   :  { %343 = vmatprep.subr.mxu0 %v135_v8  ;;  %419 = vmatprep.subr.mxu1 %v135_v8  ;;  %v111_v25 = vld [vmem:[#allocation5 + $0x18] sm:$0xff]  ;;  %v110_v27 = vld [vmem:[#allocation5 + $0x10] sm:$0xff]  ;;  %v125_v28 = vld [vmem:[#allocation5 + $0x88] sm:$0xff] }
  0x27   :  { %344 = vmatpush3.msra.mxu0 %v119_v9  ;;  %435 = vmatpush3.msra.mxu1 %v119_v9  ;;  %v109_v29 = vld [vmem:[#allocation5 + $0x8] sm:$0xff]  ;;  %v124_v30 = vld [vmem:[#allocation5 + $0x80] sm:$0xff]  ;;  %v79_v36 = vld [vmem:[#allocation2 + $0x18] sm:$0xff] }
  0x28   :  { %345 = vmatprep.subr.mxu0 %v134_v10  ;;  %420 = vmatprep.subr.mxu1 %v134_v10  ;;  %v108_v31 = vld [vmem:[#allocation5] sm:$0xff]  ;;  %v77_v32 = vld [vmem:[#allocation2 + $0x8] sm:$0xff]  ;;  %v95_v37 = vld [vmem:[#allocation2 + $0x98] sm:$0xff] }
  0x29   :  { %346 = vmatpush3.msra.mxu0 %v118_v11  ;;  %436 = vmatpush3.msra.mxu1 %v118_v11  ;;  %v93_v33 = vld [vmem:[#allocation2 + $0x88] sm:$0xff]  ;;  %v76_v34 = vld [vmem:[#allocation2] sm:$0xff]  ;;  %v78_v38 = vld [vmem:[#allocation2 + $0x10] sm:$0xff] }
  0x2a   :  { %347 = vmatprep.subr.mxu0 %v133_v12  ;;  %421 = vmatprep.subr.mxu1 %v133_v12  ;;  %v92_v35 = vld [vmem:[#allocation2 + $0x80] sm:$0xff]  ;;  %v94_v39 = vld [vmem:[#allocation2 + $0x90] sm:$0xff]  ;;  %v81_v40 = vld [vmem:[#allocation2 + $0x28] sm:$0xff] }
  0x2b   :  { %348 = vmatpush3.msra.mxu0 %v117_v13  ;;  %437 = vmatpush3.msra.mxu1 %v117_v13  ;;  %v97_v41 = vld [vmem:[#allocation2 + $0xa8] sm:$0xff]  ;;  %v80_v42 = vld [vmem:[#allocation2 + $0x20] sm:$0xff]  ;;  %v83_v44 = vld [vmem:[#allocation2 + $0x38] sm:$0xff] }
  0x2c   :  { %349 = vmatprep.subr.mxu0 %v132_v14  ;;  %422 = vmatprep.subr.mxu1 %v132_v14  ;;  %v96_v43 = vld [vmem:[#allocation2 + $0xa0] sm:$0xff]  ;;  %v99_v45 = vld [vmem:[#allocation2 + $0xb8] sm:$0xff]  ;;  %v82_v46 = vld [vmem:[#allocation2 + $0x30] sm:$0xff] }
  0x2d   :  { %350 = vmatpush3.msra.mxu0 %v116_v15  ;;  %438 = vmatpush3.msra.mxu1 %v116_v15  ;;  %v98_v47 = vld [vmem:[#allocation2 + $0xb0] sm:$0xff]  ;;  %v85_v48 = vld [vmem:[#allocation2 + $0x48] sm:$0xff]  ;;  %v84_v50 = vld [vmem:[#allocation2 + $0x40] sm:$0xff] }
  0x2e   :  { %351 = vmatprep.subr.mxu0 %v131_v16  ;;  %423 = vmatprep.subr.mxu1 %v131_v16  ;;  %v101_v49 = vld [vmem:[#allocation2 + $0xc8] sm:$0xff]  ;;  %v100_v51 = vld [vmem:[#allocation2 + $0xc0] sm:$0xff]  ;;  %v87_v52 = vld [vmem:[#allocation2 + $0x58] sm:$0xff] }
  0x2f   :  { %352 = vmatpush3.msra.mxu0 %v115_v17  ;;  %439 = vmatpush3.msra.mxu1 %v115_v17  ;;  %v103_v53 = vld [vmem:[#allocation2 + $0xd8] sm:$0xff]  ;;  %v86_v54 = vld [vmem:[#allocation2 + $0x50] sm:$0xff]  ;;  %v89_v56 = vld [vmem:[#allocation2 + $0x68] sm:$0xff] }
  0x30   :  { %353 = vmatprep.subr.mxu0 %v130_v18  ;;  %424 = vmatprep.subr.mxu1 %v130_v18  ;;  %v102_v55 = vld [vmem:[#allocation2 + $0xd0] sm:$0xff]  ;;  %v105_v57 = vld [vmem:[#allocation2 + $0xe8] sm:$0xff]  ;;  %v88_v58 = vld [vmem:[#allocation2 + $0x60] sm:$0xff] }
  0x31   :  { %354 = vmatpush3.msra.mxu0 %v114_v19  ;;  %440 = vmatpush3.msra.mxu1 %v114_v19  ;;  %v104_v59 = vld [vmem:[#allocation2 + $0xe0] sm:$0xff]  ;;  %v91_v60 = vld [vmem:[#allocation2 + $0x78] sm:$0xff]  ;;  %v90_v62 = vld [vmem:[#allocation2 + $0x70] sm:$0xff] }
  0x32   :  { %355 = vmatprep.subr.mxu0 %v129_v20  ;;  %425 = vmatprep.subr.mxu1 %v129_v20  ;;  %v107_v61 = vld [vmem:[#allocation2 + $0xf8] sm:$0xff]  ;;  %v106_v63 = vld [vmem:[#allocation2 + $0xf0] sm:$0xff] }
  0x33   :  { %356 = vmatpush3.msra.mxu0 %v113_v21  ;;  %441 = vmatpush3.msra.mxu1 %v113_v21 }
  0x34   :  { %357 = vmatprep.subr.mxu0 %v128_v22  ;;  %426 = vmatprep.subr.mxu1 %v128_v22 }
  0x35   :  { %358 = vmatpush3.msra.mxu0 %v112_v23  ;;  %442 = vmatpush3.msra.mxu1 %v112_v23 }
  0x36   :  { %359 = vmatprep.subr.mxu0 %v127_v24  ;;  %427 = vmatprep.subr.mxu1 %v127_v24 }
  0x37   :  { %360 = vmatpush3.msra.mxu0 %v111_v25  ;;  %443 = vmatpush3.msra.mxu1 %v111_v25 }
  0x38   :  { %361 = vmatprep.subr.mxu0 %v126_v26  ;;  %428 = vmatprep.subr.mxu1 %v126_v26 }
  0x39   :  { %362 = vmatpush3.msra.mxu0 %v110_v27  ;;  %444 = vmatpush3.msra.mxu1 %v110_v27 }
  0x3a   :  { %363 = vmatprep.subr.mxu0 %v125_v28  ;;  %429 = vmatprep.subr.mxu1 %v125_v28 }
  0x3b   :  { %364 = vmatpush3.msra.mxu0 %v109_v29  ;;  %445 = vmatpush3.msra.mxu1 %v109_v29 }
  0x3c   :  { %365 = vmatprep.subr.mxu0 %v124_v30  ;;  %430 = vmatprep.subr.mxu1 %v124_v30 }
  0x3d   :  { %366 = vmatpush3.msra.mxu0 %v108_v31  ;;  %446 = vmatpush3.msra.mxu1 %v108_v31 }
  0x3e   :  { %204 = vmatprep.mubr.f32.mxu0 %v77_v32  ;;  %244 = vmatprep.mubr.f32.mxu1 %v93_v33 }
  0x3f   :  { %205 = vmatmul.mubr.f32.vlgmr.msra.gmra.mxu0 %v76_v34  ;;  %245 = vmatmul.mubr.f32.vlgmr.msra.gmra.mxu1 %v92_v35 }
  0x40   :  { %209 = vmatprep.mubr.f32.mxu0 %v79_v36  ;;  %249 = vmatprep.mubr.f32.mxu1 %v95_v37 }
  0x43   :  { %210 = vmatmul.mubr.f32.gmra.mxu0 %v78_v38  ;;  %250 = vmatmul.mubr.f32.gmra.mxu1 %v94_v39 }
  0x44   :  { %214 = vmatprep.mubr.f32.mxu0 %v81_v40  ;;  %254 = vmatprep.mubr.f32.mxu1 %v97_v41 }
  0x47   :  { %215 = vmatmul.mubr.f32.gmra.mxu0 %v80_v42  ;;  %255 = vmatmul.mubr.f32.gmra.mxu1 %v96_v43 }
  0x48   :  { %219 = vmatprep.mubr.f32.mxu0 %v83_v44  ;;  %259 = vmatprep.mubr.f32.mxu1 %v99_v45 }
  0x4b   :  { %220 = vmatmul.mubr.f32.gmra.mxu0 %v82_v46  ;;  %260 = vmatmul.mubr.f32.gmra.mxu1 %v98_v47 }
  0x4c   :  { %224 = vmatprep.mubr.f32.mxu0 %v85_v48  ;;  %264 = vmatprep.mubr.f32.mxu1 %v101_v49 }
  0x4f   :  { %225 = vmatmul.mubr.f32.gmra.mxu0 %v84_v50  ;;  %265 = vmatmul.mubr.f32.gmra.mxu1 %v100_v51 }
  0x50   :  { %229 = vmatprep.mubr.f32.mxu0 %v87_v52  ;;  %269 = vmatprep.mubr.f32.mxu1 %v103_v53 }
  0x53   :  { %230 = vmatmul.mubr.f32.gmra.mxu0 %v86_v54  ;;  %270 = vmatmul.mubr.f32.gmra.mxu1 %v102_v55 }
  0x54   :  { %234 = vmatprep.mubr.f32.mxu0 %v89_v56  ;;  %274 = vmatprep.mubr.f32.mxu1 %v105_v57 }
  0x57   :  { %235 = vmatmul.mubr.f32.gmra.mxu0 %v88_v58  ;;  %275 = vmatmul.mubr.f32.gmra.mxu1 %v104_v59 }
  0x58   :  { %239 = vmatprep.mubr.f32.mxu0 %v91_v60  ;;  %279 = vmatprep.mubr.f32.mxu1 %v107_v61 }
  0x5b   :  { %240 = vmatmul.mubr.f32.gmra.mxu0 %v90_v62  ;;  %280 = vmatmul.mubr.f32.gmra.mxu1 %v106_v63 }
  0xff   :  { %v367_v0 = vpop.f32.mrf.mxu0  ;;  %v391_v1 = vpop.f32.mrf.mxu1 }
 0x101   :  { %v368_v2 = vpop.f32.mrf.mxu0  ;;  %v392_v3 = vpop.f32.mrf.mxu1 }
 0x102   :  { %v369_v4 = vadd.f32 %v368_v2, %v367_v0  ;;  %v393_v5 = vadd.f32 %v392_v3, %v391_v1 }
 0x103   :  { %v370_v6 = vpop.f32.mrf.mxu0  ;;  %v394_v7 = vpop.f32.mrf.mxu1 }
 0x104   :  { %301 = vst [vmem:[#allocation7] sm:$0xff] %v369_v4  ;;  %309 = vst [vmem:[#allocation7 + $0x40] sm:$0xff] %v393_v5 }
 0x105   :  { %v371_v8 = vpop.f32.mrf.mxu0  ;;  %v395_v9 = vpop.f32.mrf.mxu1 }
 0x106   :  { %v372_v10 = vadd.f32 %v371_v8, %v370_v6  ;;  %v396_v11 = vadd.f32 %v395_v9, %v394_v7 }
 0x107   :  { %v373_v12 = vpop.f32.mrf.mxu0  ;;  %v397_v13 = vpop.f32.mrf.mxu1 }
 0x108   :  { %302 = vst [vmem:[#allocation7 + $0x8] sm:$0xff] %v372_v10  ;;  %310 = vst [vmem:[#allocation7 + $0x48] sm:$0xff] %v396_v11 }
 0x109   :  { %v374_v14 = vpop.f32.mrf.mxu0  ;;  %v398_v15 = vpop.f32.mrf.mxu1 }
 0x10a   :  { %v375_v16 = vadd.f32 %v374_v14, %v373_v12  ;;  %v399_v17 = vadd.f32 %v398_v15, %v397_v13 }
 0x10b   :  { %v376_v18 = vpop.f32.mrf.mxu0  ;;  %v400_v19 = vpop.f32.mrf.mxu1 }
 0x10c   :  { %303 = vst [vmem:[#allocation7 + $0x10] sm:$0xff] %v375_v16  ;;  %311 = vst [vmem:[#allocation7 + $0x50] sm:$0xff] %v399_v17 }
 0x10d   :  { %v377_v20 = vpop.f32.mrf.mxu0  ;;  %v401_v21 = vpop.f32.mrf.mxu1 }
 0x10e   :  { %v378_v22 = vadd.f32 %v377_v20, %v376_v18  ;;  %v402_v23 = vadd.f32 %v401_v21, %v400_v19 }
 0x10f   :  { %v379_v24 = vpop.f32.mrf.mxu0  ;;  %v403_v25 = vpop.f32.mrf.mxu1 }
 0x110   :  { %304 = vst [vmem:[#allocation7 + $0x18] sm:$0xff] %v378_v22  ;;  %312 = vst [vmem:[#allocation7 + $0x58] sm:$0xff] %v402_v23 }
 0x111   :  { %v380_v26 = vpop.f32.mrf.mxu0  ;;  %v404_v27 = vpop.f32.mrf.mxu1 }
 0x112   :  { %v381_v28 = vadd.f32 %v380_v26, %v379_v24  ;;  %v405_v29 = vadd.f32 %v404_v27, %v403_v25 }
 0x113   :  { %v382_v30 = vpop.f32.mrf.mxu0  ;;  %v406_v31 = vpop.f32.mrf.mxu1 }
 0x114   :  { %305 = vst [vmem:[#allocation7 + $0x20] sm:$0xff] %v381_v28  ;;  %313 = vst [vmem:[#allocation7 + $0x60] sm:$0xff] %v405_v29 }
 0x115   :  { %v383_v32 = vpop.f32.mrf.mxu0  ;;  %v407_v33 = vpop.f32.mrf.mxu1 }
 0x116   :  { %v384_v34 = vadd.f32 %v383_v32, %v382_v30  ;;  %v408_v35 = vadd.f32 %v407_v33, %v406_v31 }
 0x117   :  { %v385_v36 = vpop.f32.mrf.mxu0  ;;  %v409_v37 = vpop.f32.mrf.mxu1 }
 0x118   :  { %306 = vst [vmem:[#allocation7 + $0x28] sm:$0xff] %v384_v34  ;;  %314 = vst [vmem:[#allocation7 + $0x68] sm:$0xff] %v408_v35 }
 0x119   :  { %v386_v38 = vpop.f32.mrf.mxu0  ;;  %v410_v39 = vpop.f32.mrf.mxu1 }
 0x11a   :  { %v387_v40 = vadd.f32 %v386_v38, %v385_v36  ;;  %v411_v41 = vadd.f32 %v410_v39, %v409_v37 }
 0x11b   :  { %v388_v42 = vpop.f32.mrf.mxu0  ;;  %v412_v43 = vpop.f32.mrf.mxu1 }
 0x11c   :  { %307 = vst [vmem:[#allocation7 + $0x30] sm:$0xff] %v387_v40  ;;  %315 = vst [vmem:[#allocation7 + $0x70] sm:$0xff] %v411_v41 }
 0x11d   :  { %v389_v44 = vpop.f32.mrf.mxu0  ;;  %v413_v45 = vpop.f32.mrf.mxu1 }
 0x11e   :  { %v390_v46 = vadd.f32 %v389_v44, %v388_v42  ;;  %v414_v47 = vadd.f32 %v413_v45, %v412_v43 }
 0x120   :  { %308 = vst [vmem:[#allocation7 + $0x38] sm:$0xff] %v390_v46  ;;  %316 = vst [vmem:[#allocation7 + $0x78] sm:$0xff] %v414_v47 }
 0x121   :  { %506 = shalt.err (!%p503_p0)
}
 0x122   :  { %328 = dma.vmem_to_hbm [thread:$0]  %s323_s1, 2048, %s560_s2, [#allocation4], %s525_s19, %s525_s19, %s526_s20  }
 0x123   :  { %519 = dma.done.wait [#allocation4], 2048  }
 0x124   :  { %520 = vsyncadd [#allocation4], 4294965248 }
 0x125   :  { %332 = vsyncpa [#allocation3], 1 }
 0x126   :  { %333 = vsyncpa [#allocation6], 1 }
 0x127   :  { %334 = vsyncpa [#allocation4], 1 }

</bundles_post_ra>
